<compile_context>
chip_gen: v7x
topology: tpu7x:2x2x1
jax: 0.10.0
libtpu: 0.0.40
codegen_flags: <defaults>
</compile_context>

<pallas_src>
import functools

import jax
import jax.numpy as jnp
from jax.experimental import pallas as pl
from jax.experimental.pallas import tpu as pltpu

GAMMA = 2.0
IGNORE_INDEX = -100


def _focal_partials_kernel(logits_ref, labels_ref, out_ref, *, n_valid, tile_n,
                           ignore_index):
    """One N-tile -> lane-dense (8,128) partial block (sum_nll, count)."""
    i = pl.program_id(0)

    logits = logits_ref[...].astype(jnp.float32)             # (TILE_N, C)
    labels = labels_ref[...]                                  # (TILE_N, 1) int32

    # ---- validity mask: real (non-padded) rows AND label != ignore_index ----
    row = jax.lax.broadcasted_iota(jnp.int32, (tile_n, 1), 0) + i * tile_n
    valid = (row < n_valid) & (labels != ignore_index)        # (TILE_N, 1)

    # ---- numerically stable logsumexp along class (lane) axis ----
    m = jnp.max(logits, axis=-1, keepdims=True)               # (TILE_N, 1)
    lse = jnp.log(jnp.sum(jnp.exp(logits - m), axis=-1, keepdims=True))

    # ---- gather logits[label] via one-hot compare (no logp materialization) ----
    col = jax.lax.broadcasted_iota(jnp.int32, logits.shape, 1)
    picked = jnp.sum(jnp.where(col == labels, logits, 0.0),
                     axis=-1, keepdims=True)                  # (TILE_N, 1)

    # nll = logsumexp(logits) - logits[label]; select-mask padded/ignored rows
    # (keep jnp.where: it is a select, so Inf/NaN in clamped rows don't leak).
    nll = (m + lse) - picked
    nll = jnp.where(valid, nll, 0.0)

    total = jnp.sum(nll)                                      # scalar
    count = jnp.sum(valid.astype(jnp.float32))                # scalar

    # lane-dense, (8,128)-aligned partial block: lane0 = sum_nll, lane1 = count
    lane = jax.lax.broadcasted_iota(jnp.int32, (1, 8, 128), 2)
    out_ref[...] = jnp.where(lane == 0, total,
                             jnp.where(lane == 1, count, 0.0))


def _round_up(x, m):
    return ((x + m - 1) // m) * m


def _vmem_params():
    """Generation-aware (vmem_limit_bytes, target per-buffer input-tile bytes)."""
    cap = None
    try:
        cap = getattr(pltpu.get_tpu_info(), "vmem_capacity_bytes", None)
    except Exception:
        cap = None
    if cap is None:
        cap = 64 << 20                       # conservative: assume v7x-sized VMEM
    if cap >= (100 << 20):                   # v5e / v6e: 128 MiB physical VMEM
        return 96 << 20, 8 << 20
    # v7x: 64 MiB per TC -> smaller limit/tile so double buffering survives.
    return 48 << 20, 5 << 20


def _choose_tile_n(n, c, itemsize, vmem_limit_bytes, target_tile_bytes):
    """Byte-based, dtype-aware tile sizing with explicit VMEM accounting."""
    c_pad = _round_up(max(c, 1), 128)
    in_row = c_pad * itemsize                # one logits row in its streamed dtype
    # Per-row VMEM cost:
    #   2 x input tile (double buffer) + 2 x labels tile ((tile_n,1) int32 pads
    #   to 128 lanes -> 512 B/row) + ~3 x f32 temporaries (cast / exp / masked).
    per_row = 2 * in_row + 2 * 512 + 3 * c_pad * 4
    usable = max(per_row * 8, vmem_limit_bytes - (4 << 20))   # leave headroom
    t_vmem = max(8, usable // per_row)
    t_target = max(8, target_tile_bytes // in_row)
    t = min(t_vmem, t_target)
    t = max(8, (t // 8) * 8)
    # Keep at least two grid steps when possible so v7x's two TensorCores both
    # get work on the "parallel" axis; ~free on 1-TC v5e/v6e.
    if n > 8:
        t = min(t, _round_up(pl.cdiv(n, 2), 8))
    t = min(t, _round_up(n, 8))
    return max(8, t)


def focal_loss_pallas(logits, labels, *, gamma=GAMMA, ignore_index=IGNORE_INDEX,
                      tile_n=None):
    """logits: (N, C) float array (f32 or bf16); labels: (N,) int array.

    Returns scalar f32 focal loss (module defaults: alpha=None, mean reduction).
    """
    n, c = logits.shape
    labels2d = labels.reshape(n, 1).astype(jnp.int32)

    vmem_limit_bytes, target_tile_bytes = _vmem_params()
    itemsize = jnp.dtype(logits.dtype).itemsize

    if tile_n is None:
        tile_n = _choose_tile_n(n, c, itemsize, vmem_limit_bytes,
                                target_tile_bytes)
    tile_n = max(8, (tile_n // 8) * 8)
    num_tiles = pl.cdiv(n, tile_n)

    kernel = functools.partial(_focal_partials_kernel, n_valid=n, tile_n=tile_n,
                               ignore_index=ignore_index)

    partials = pl.pallas_call(
        kernel,
        out_shape=jax.ShapeDtypeStruct((num_tiles, 8, 128), jnp.float32),
        grid_spec=pltpu.PrefetchScalarGridSpec(
            num_scalar_prefetch=0,
            grid=(num_tiles,),
            in_specs=[
                pl.BlockSpec((tile_n, c), lambda i: (i, 0)),   # logits tile
                pl.BlockSpec((tile_n, 1), lambda i: (i, 0)),   # labels tile
            ],
            out_specs=pl.BlockSpec((1, 8, 128), lambda i: (i, 0, 0)),
        ),
        compiler_params=pltpu.CompilerParams(
            dimension_semantics=("parallel",),
            vmem_limit_bytes=vmem_limit_bytes,
        ),
    )(logits, labels2d)

    # ---- tiny scalar epilogue in JAX (single reduce, kept out of the body) ----
    col = jnp.sum(partials[:, 0, :], axis=0)        # (128,)
    total, count = col[0], col[1]
    ce = total / count                     # NaN if count == 0 (torch semantics)
    pt = jnp.exp(-ce)
    one_minus = 1.0 - pt
    if gamma == 2.0:
        focal = one_minus * one_minus      # avoid EUP pow for the default gamma
    else:
        focal = one_minus ** gamma
    return focal * ce


def focal_loss_ref(logits, labels, *, gamma=GAMMA, ignore_index=IGNORE_INDEX):
    """Pure-JAX reference mirroring the PyTorch module with default args."""
    logits = logits.astype(jnp.float32)
    logp = jax.nn.log_softmax(logits, axis=-1)
    safe_labels = jnp.where(labels == ignore_index, 0, labels)
    nll = -jnp.take_along_axis(logp, safe_labels[:, None], axis=-1)[:, 0]
    valid = labels != ignore_index
    ce = jnp.sum(jnp.where(valid, nll, 0.0)) / jnp.sum(valid.astype(jnp.float32))
    pt = jnp.exp(-ce)
    return (1.0 - pt) ** gamma * ce


if __name__ == "__main__":
    key = jax.random.PRNGKey(0)
    k1, k2, k3, k4 = jax.random.split(key, 4)

    # ---- test 1: f32 logits, auto tile sizing, multi-tile grid ----
    N, C = 24, 128
    logits = jax.random.normal(k1, (N, C), dtype=jnp.float32)
    labels = jax.random.randint(k2, (N,), 0, C, dtype=jnp.int32)
    labels = labels.at[3].set(IGNORE_INDEX).at[17].set(IGNORE_INDEX)

    out = jax.block_until_ready(focal_loss_pallas(logits, labels))
    ref = focal_loss_ref(logits, labels)
    assert jnp.allclose(out, ref, rtol=1e-5, atol=1e-6), (out, ref)

    # ---- test 2: partial last tile (N % TILE_N != 0) and non-128-multiple C ----
    N2, C2 = 20, 48
    logits2 = jax.random.normal(k3, (N2, C2), dtype=jnp.float32)
    labels2 = jax.random.randint(k4, (N2,), 0, C2, dtype=jnp.int32)
    labels2 = labels2.at[0].set(IGNORE_INDEX)

    out2 = jax.block_until_ready(focal_loss_pallas(logits2, labels2, tile_n=8))
    ref2 = focal_loss_ref(logits2, labels2)
    assert jnp.allclose(out2, ref2, rtol=1e-5, atol=1e-6), (out2, ref2)

    # ---- test 3: bf16 logits streamed as-is, cast to f32 inside the kernel ----
    logits_bf16 = logits.astype(jnp.bfloat16)
    out3 = jax.block_until_ready(focal_loss_pallas(logits_bf16, labels))
    ref3 = focal_loss_ref(logits_bf16, labels)
    assert jnp.allclose(out3, ref3, rtol=1e-4, atol=1e-5), (out3, ref3)

    # ---- test 4: all-negative logits, C not a multiple of 128 (max path) ----
    logits4 = -jnp.abs(jax.random.normal(k3, (N2, C2), dtype=jnp.float32)) - 5.0
    out4 = jax.block_until_ready(focal_loss_pallas(logits4, labels2, tile_n=8))
    ref4 = focal_loss_ref(logits4, labels2)
    assert jnp.allclose(out4, ref4, rtol=1e-5, atol=1e-6), (out4, ref4)

    # ---- test 5: all labels ignored -> NaN (matches torch mean-CE 0/0) ----
    labels5 = jnp.full((N,), IGNORE_INDEX, dtype=jnp.int32)
    out5 = jax.block_until_ready(focal_loss_pallas(logits, labels5))
    assert bool(jnp.isnan(out5)), out5

    print("KERNEL_OK")
</pallas_src>

<mosaic_0001>
module attributes {stable_mosaic.version = 11 : i64} {
  func.func @_focal_partials_kernel(%arg0: i32, %arg1: memref<16x128xf32, #tpu.memory_space<vmem>>, %arg2: memref<16x1xi32, #tpu.memory_space<vmem>>, %arg3: memref<1x8x128xf32, #tpu.memory_space<vmem>>) attributes {dimension_semantics = [#tpu.dimension_semantics<parallel>], iteration_bounds = array<i64: 2>, scalar_prefetch = 0 : i64, scratch_operands = 0 : i64, tpu.core_type = #tpu.core_type<tc>, window_params = [{transform_indices = @transform_0, window_bounds = array<i64: 16, 128>}, {transform_indices = @transform_1, window_bounds = array<i64: 16, 1>}, {transform_indices = @transform_2, window_bounds = array<i64: 1, 8, 128>}]} {
    %c0 = arith.constant 0 : index
    %c0_0 = arith.constant 0 : index
    %0 = vector.load %arg1[%c0, %c0_0] : memref<16x128xf32, #tpu.memory_space<vmem>>, vector<16x128xf32>
    %c0_1 = arith.constant 0 : index
    %c0_2 = arith.constant 0 : index
    %1 = vector.load %arg2[%c0_1, %c0_2] : memref<16x1xi32, #tpu.memory_space<vmem>>, vector<16x1xi32>
    %2 = tpu.iota {dimensions = array<i32: 0>} : vector<16x1xi32>
    %c16_i32 = arith.constant 16 : i32
    %3 = arith.muli %arg0, %c16_i32 : i32
    %4 = vector.broadcast %3 : i32 to vector<16x1xi32>
    %5 = arith.addi %2, %4 : vector<16x1xi32>
    %c24_i32 = arith.constant 24 : i32
    %6 = vector.broadcast %c24_i32 : i32 to vector<16x1xi32>
    %7 = arith.cmpi slt, %5, %6 : vector<16x1xi32>
    %c-100_i32 = arith.constant -100 : i32
    %8 = vector.broadcast %c-100_i32 : i32 to vector<16x1xi32>
    %9 = arith.cmpi ne, %1, %8 : vector<16x1xi32>
    %10 = arith.andi %7, %9 : vector<16x1xi1>
    %cst = arith.constant dense<0xFF800000> : vector<16xf32>
    %11 = vector.multi_reduction <maximumf>, %0, %cst [1] : vector<16x128xf32> to vector<16xf32>
    %12 = vector.shape_cast %11 : vector<16xf32> to vector<16x1xf32>
    %13 = vector.broadcast %12 : vector<16x1xf32> to vector<16x128xf32>
    %14 = arith.subf %0, %13 : vector<16x128xf32>
    %15 = math.exp %14 : vector<16x128xf32>
    %cst_3 = arith.constant dense<0.000000e+00> : vector<16xf32>
    %16 = vector.multi_reduction <add>, %15, %cst_3 [1] : vector<16x128xf32> to vector<16xf32>
    %17 = vector.shape_cast %16 : vector<16xf32> to vector<16x1xf32>
    %18 = math.log %17 : vector<16x1xf32>
    %19 = tpu.iota {dimensions = array<i32: 1>} : vector<16x128xi32>
    %20 = vector.broadcast %1 : vector<16x1xi32> to vector<16x128xi32>
    %21 = arith.cmpi eq, %19, %20 : vector<16x128xi32>
    %cst_4 = arith.constant 0.000000e+00 : f32
    %22 = vector.broadcast %cst_4 : f32 to vector<16x128xf32>
    %23 = arith.select %21, %0, %22 : vector<16x128xi1>, vector<16x128xf32>
    %cst_5 = arith.constant dense<0.000000e+00> : vector<16xf32>
    %24 = vector.multi_reduction <add>, %23, %cst_5 [1] : vector<16x128xf32> to vector<16xf32>
    %25 = vector.shape_cast %24 : vector<16xf32> to vector<16x1xf32>
    %26 = arith.addf %12, %18 : vector<16x1xf32>
    %27 = arith.subf %26, %25 : vector<16x1xf32>
    %cst_6 = arith.constant 0.000000e+00 : f32
    %28 = vector.broadcast %cst_6 : f32 to vector<16x1xf32>
    %29 = arith.select %10, %27, %28 : vector<16x1xi1>, vector<16x1xf32>
    %30 = vector.shape_cast %29 : vector<16x1xf32> to vector<1x16x1xf32>
    %cst_7 = arith.constant dense<0.000000e+00> : vector<1xf32>
    %31 = vector.multi_reduction <add>, %30, %cst_7 [1, 2] : vector<1x16x1xf32> to vector<1xf32>
    %32 = vector.shape_cast %31 : vector<1xf32> to vector<1x1x1xf32>
    %33 = vector.extract %32[0, 0, 0] : f32 from vector<1x1x1xf32>
    %34 = arith.extui %10 : vector<16x1xi1> to vector<16x1xi32>
    %35 = arith.sitofp %34 : vector<16x1xi32> to vector<16x1xf32>
    %36 = vector.shape_cast %35 : vector<16x1xf32> to vector<1x16x1xf32>
    %cst_8 = arith.constant dense<0.000000e+00> : vector<1xf32>
    %37 = vector.multi_reduction <add>, %36, %cst_8 [1, 2] : vector<1x16x1xf32> to vector<1xf32>
    %38 = vector.shape_cast %37 : vector<1xf32> to vector<1x1x1xf32>
    %39 = vector.extract %38[0, 0, 0] : f32 from vector<1x1x1xf32>
    %40 = tpu.iota {dimensions = array<i32: 2>} : vector<1x8x128xi32>
    %c0_i32 = arith.constant 0 : i32
    %41 = vector.broadcast %c0_i32 : i32 to vector<1x8x128xi32>
    %42 = arith.cmpi eq, %40, %41 : vector<1x8x128xi32>
    %c1_i32 = arith.constant 1 : i32
    %43 = vector.broadcast %c1_i32 : i32 to vector<1x8x128xi32>
    %44 = arith.cmpi eq, %40, %43 : vector<1x8x128xi32>
    %cst_9 = arith.constant 0.000000e+00 : f32
    %45 = vector.broadcast %39 : f32 to vector<1x8x128xf32>
    %46 = vector.broadcast %cst_9 : f32 to vector<1x8x128xf32>
    %47 = arith.select %44, %45, %46 : vector<1x8x128xi1>, vector<1x8x128xf32>
    %48 = vector.broadcast %33 : f32 to vector<1x8x128xf32>
    %49 = arith.select %42, %48, %47 : vector<1x8x128xi1>, vector<1x8x128xf32>
    %c0_10 = arith.constant 0 : index
    %c0_11 = arith.constant 0 : index
    %c0_12 = arith.constant 0 : index
    %50 = vector.load %arg3[%c0_10, %c0_11, %c0_12] : memref<1x8x128xf32, #tpu.memory_space<vmem>>, vector<1x8x128xf32>
    tpu.vector_store %arg3[%c0_10, %c0_11, %c0_12], %49 {strides = array<i32>} : memref<1x8x128xf32, #tpu.memory_space<vmem>>, vector<1x8x128xf32>,
    return
  }
  func.func @transform_0(%arg0: i32) -> (i32, i32) {
    %c0_i32 = arith.constant 0 : i32
    %c0_i32_0 = arith.constant 0 : i32
    return %arg0, %c0_i32 : i32, i32
  }
  func.func @transform_1(%arg0: i32) -> (i32, i32) {
    %c0_i32 = arith.constant 0 : i32
    %c0_i32_0 = arith.constant 0 : i32
    return %arg0, %c0_i32 : i32, i32
  }
  func.func @transform_2(%arg0: i32) -> (i32, i32, i32) {
    %c0_i32 = arith.constant 0 : i32
    %c0_i32_0 = arith.constant 0 : i32
    %c0_i32_1 = arith.constant 0 : i32
    return %arg0, %c0_i32, %c0_i32_0 : i32, i32, i32
  }
}

</mosaic_0001>

<bundles_post_ra>
// kernel: tpu_custom_call.1
= control target key start
LH: loop header
LB: loop body
LE: loop exit
PB: predicated region body
PF: predicated region fallthrough
CT: control target
= control target key end

     0   :  { %7 = vsyncpa [#allocation3], 0  ;;  %s666_s0 = inlined_call_operand.vmem [shape: f32[24,128], index: 0, kind: input, shape index: {}]   ;;  %s667_s1 = inlined_call_operand.vmem [shape: s32[24,1], index: 1, kind: input, shape index: {}]   ;;  %s668_s2 = inlined_call_operand.hbm [shape: f32[2,8,128], index: 2, kind: output, shape index: {}]  }
   0x1   :  { %9 = vsyncpa [#allocation3 + $0x1], 0  ;;  %s537_s9 = smov 0   ;;  %s539_s10 = smov 0  }
   0x2   :  { %s541_s11 = smov 0   ;;  %s543_s12 = smov 0  }
   0x3 LB: > { %s558_s13 = sadd.s32 4294967295, %s517_s12   ;;  %s384_s14 = sadd.s32 4294967294, %s517_s12   ;;  %s517_s12 = sphi %s543_s12, %s678_s12   ;;  %s513_s11 = sphi %s541_s11, %s677_s11   ;;  %s509_s10 = sphi %s539_s10, %s676_s10   ;;  %s505_s9 = sphi %s537_s9, %s675_s9  }
   0x4   : > { %s562_s15 = sadd.s32 1, %s517_s12   ;;  %s74_s16 = sadd.s32 1, %s513_s11 }
   0x5   : > { %s71_s17 = ssub.s32 %s517_s12, %s562_s15  ;;  %p84_p0 = scmp.ne.s32.totalorder %s513_s11, %s509_s10 }
   0x6   : > { %p72_p1 = scmp.eq.s32.totalorder %s71_s17, 0  ;;  %p85_p2 = scmp.eq.s32.totalorder %s558_s13, 1 }
   0x7   : > { %p90_p3 = scmp.ne.s32.totalorder %s509_s10, %s505_s9  ;;  %p91_p4 = scmp.eq.s32.totalorder %s384_s14, 1 }
   0x8   : > { %s573_s18 = scalar_select %p72_p1, %s513_s11, %s74_s16  }
   0x9   : > { %p575_p5 = por %p85_p2, %p84_p0  ;;  %p579_p6 = por %p91_p4, %p90_p3 }
   0xa   : > { %p387_p7 = scmp.ge.s32.totalorder %s517_s12, 1  ;;  %p143_p8 = scmp.lt.s32.totalorder %s517_s12, 3 }
   0xc   : > { %p144_p9 = pnand %p387_p7, %p143_p8 }
   0xd   : > { %s389_s21 = sshll.u32 (!%p144_p9), %s558_s13, 1  ;;  %v210_v0 = vlaneseq (!%p144_p9)  ;;  %s393_s22 = sshll.u32 (!%p144_p9), %s558_s13, 4  ;;  %v519_v1 = vmov (!%p144_p9), 0   ;;  %vm263_vm8 = vcmask (!%p144_p9), 7168   ;;  %v520_v26 = vmov (!%p144_p9), 0.0  }
   0xe   : > { %147 = sbr.rel (%p144_p9) target bundleno = 574 (0x23e), region = 28  ;;  %p183_p10 = scmp.lt.s32.totalorder (!%p144_p9), %s389_s21, 2  ;;  %445 = vset.pattern.permute.xlu1 (!%p144_p9), %v519_v1  ;;  %v214_v2 = vstv (!%p144_p9), %s393_s22  ;;  %446 = vset.pattern.permute.xlu0 (!%p144_p9), %v519_v1 }
   0xf   : > { %v211_v3 = vshrl.u32 (!%p144_p9), %v210_v0, 7  ;;  %v597_v17 = vand.u32 (!%p144_p9), 127, %v210_v0  ;;  %s175_s30 = sand.u32 (!%p144_p9), 1, %s509_s10   ;;  %s397_s4 = sshll.u32 (!%p144_p9), %s558_s13, 7 }
  0x10   : > { %s388_s3 = sshll.u32 (!%p144_p9), %s175_s30, 3  ;;  %s624_s17 = scalar_lea.hbm (!%p144_p9), %s668_s2, %s397_s4 }
  0x11   : > { %v215_v4 = vadd.s32 (!%p144_p9), %v214_v2, %v211_v3  ;;  %v212_v23 = vadd.s32 (!%p144_p9), 8, %v211_v3  ;;  %vm293_vm9 = vcmp.eq.s32.totalorder (!%p144_p9), %v597_v17, 1  ;;  %s177_s6 = scalar_lea.vmem (!%p144_p9), [#allocation2], %s388_s3  ;;  %vm292_vm10 = vcmp.eq.s32.totalorder (!%p144_p9), %v597_v17, 0  ;;  %s300_s13 = scalar_lea.sflag (!%p144_p9), [#allocation3], %s175_s30 }
  0x12   : > { %s313_s7 = sshll.u32 (!%p144_p9), %s177_s6, 4  ;;  %s521_s22 = smov (!%p144_p9), [#allocation2]   ;;  %s626_s7 = int_to_ptr.vmem [resolvable:$true] %s313_s7 }
  0x13   : > { %vm217_vm0 = vcmp.lt.s32.totalorder (!%p144_p9), %v215_v4, 24  ;;  %v216_v24 = vadd.s32 (!%p144_p9), %v214_v2, %v212_v23 }
  0x15   : > { %s680_s21 = smov (!%p183_p10, %s389_s21), 2  ;;  %vm218_vm6 = vcmp.lt.s32.totalorder %v216_v24, 24 }
  0x16   : > { %s390_s23 = sshll.u32 %s680_s21, 3  ;;  %s455_s21 = scalar_lea.vmem %s626_s7, 128 }
  0x17   : > { %s186_s26 = scalar_lea.vmem %s666_s0, %s390_s23  ;;  %s200_s29 = scalar_lea.vmem %s667_s1, %s390_s23 }
  0x18   : > { %v206_v5 = vld [vmem:[%s186_s26] sm:$0xff]  ;;  %v207_v7 = vld [vmem:[%s186_s26 + $0x8] sm:$0xff]  ;;  %p456_p11 = scmp.ne.s32.totalorder %s626_s7, %s455_s21  ;;  %s459_s23 = sshll.u32 %s521_s22, 4  ;;  %s460_s23 = int_to_ptr.vmem [resolvable:$false] %s459_s23 }
  0x19   : > { %v208_v6 = vld [vmem:[%s200_s29] sm:$0xff]  ;;  %223 = vmax.xlane.f32.xlu0 %v206_v5  ;;  %v209_v9 = vld [vmem:[%s200_s29 + $0x8] sm:$0xff]  ;;  %s461_s24 = scalar_lea.vmem %s460_s23, 256  ;;  %p462_p0 = scmp.lt.s32.totalorder %s626_s7, %s460_s23 }
  0x1a   : > { %244 = vperm.xlu1 %445, %v208_v6   ;;  %vm219_vm1 = vcmp.ne.s32.totalorder %v208_v6, 4294967196  ;;  %vm220_vm5 = vcmp.ne.s32.totalorder %v209_v9, 4294967196  ;;  %p457_p12 = pnand %p456_p11, %p575_p5  ;;  %p463_p1 = scmp.lt.s32.totalorder %s461_s24, %s455_s21 }
  0x1b   : > { %vm593_vm2 = vmand %vm217_vm0, %vm219_vm1 }
  0x1c   : > { %vm601_vm7 = vmand %vm218_vm6, %vm220_vm5  ;;  %v394_v27 = vsel %vm593_vm2, 1.0, %v520_v26  ;;  %p458_p13 = pneg %p457_p12  ;;  %p464_p2 = por %p463_p1, %p462_p0 }
  0x1d   : > { %225 = vmax.xlane.f32.xlu0 %v207_v7  ;;  %v395_v28 = vsel %vm601_vm7, 1.0, %v520_v26  ;;  %v280_v29 = vsel %vm263_vm8, %v394_v27, 0.0 }
  0x1e   : > { %247 = vperm.xlu1 %445, %v209_v9   ;;  %v281_v30 = vsel %vm263_vm8, %v395_v28, 0.0  ;;  %p465_p3 = pnand %p464_p2, %p458_p13 }
  0x1f   : > { %v282_v31 = vadd.f32 %v281_v30, %v280_v29 }
  0x99   : > { %v245_v16 = vpop.permute.xlu1 %244 }
  0x9a   : > { %vm249_vm3 = vcmp.eq.s32.totalorder %v597_v17, %v245_v16 }
  0x9b   : > { %v251_v20 = vsel %vm249_vm3, %v206_v5, 0.0 }
  0x9d   : > { %v248_v19 = vpop.permute.xlu1 %247 }
  0x9e   : > { %vm250_vm4 = vcmp.eq.s32.totalorder %v597_v17, %v248_v19 }
  0x9f   : > { %v252_v22 = vsel %vm250_vm4, %v207_v7, 0.0 }
  0xa6   : > { %v224_v10 = vpop.xlane.xlu0 %223 }
  0xa7   : > { %v227_v11 = vsub.f32 %v206_v5, %v224_v10 }
  0xa9   : > { %v229_v12 = vmul.f32 1.442695, %v227_v11 }
  0xaa   : > { %v226_v13 = vpop.xlane.xlu0 %225 }
  0xab   : > { %447 = vpow2.f32 %v229_v12  ;;  %v228_v14 = vsub.f32 %v207_v7, %v226_v13 }
  0xad   : > { %v231_v15 = vmul.f32 1.442695, %v228_v14 }
  0xaf   : > { %449 = vpow2.f32 %v231_v15 }
  0xb5   : > { %v448_v18 = vpop.eup %447 }
  0xb6   : > { %233 = vadd.xlane.f32.xlu0 %v448_v18 }
  0xb9   : > { %v450_v21 = vpop.eup %449 }
  0xba   : > { %235 = vadd.xlane.f32.xlu1 %v450_v21  ;;  %253 = vadd.xlane.f32.xlu0 %v251_v20 }
  0xbe   : > { %255 = vadd.xlane.f32.xlu0 %v252_v22 }
 0x143   : > { %v234_v32 = vpop.xlane.xlu0 %233 }
 0x144   : > { %451 = vlog2.f32 %v234_v32 }
 0x147   : > { %v236_v33 = vpop.xlane.xlu1 %235  ;;  %v254_v36 = vpop.xlane.xlu0 %253 }
 0x148   : > { %453 = vlog2.f32 %v236_v33 }
 0x14b   : > { %v256_v42 = vpop.xlane.xlu0 %255 }
 0x14e   : > { %v452_v34 = vpop.eup %451 }
 0x14f   : > { %v238_v35 = vmul.f32 0.6931472, %v452_v34 }
 0x151   : > { %v257_v37 = vadd.f32 %v238_v35, %v224_v10 }
 0x152   : > { %v454_v38 = vpop.eup %453 }
 0x153   : > { %v240_v39 = vmul.f32 0.6931472, %v454_v38  ;;  %v259_v40 = vsub.f32 %v257_v37, %v254_v36 }
 0x155   : > { %v258_v41 = vadd.f32 %v240_v39, %v226_v13  ;;  %v261_v43 = vsel %vm593_vm2, %v259_v40, 0.0 }
 0x156   : > { %v264_v46 = vsel %vm263_vm8, %v261_v43, 0.0 }
 0x157   : > { %v260_v44 = vsub.f32 %v258_v41, %v256_v42 }
 0x159   : > { %v262_v45 = vsel %vm601_vm7, %v260_v44, 0.0 }
 0x15a   : > { %v265_v47 = vsel %vm263_vm8, %v262_v45, 0.0 }
 0x15b   : > { %v266_v48 = vadd.f32 %v265_v47, %v264_v46 }
 0x15d   : > { %267 = vadd.xlane.f32.xlu0 %v266_v48 }
 0x161   : > { %283 = vadd.xlane.f32.xlu0 %v282_v31 }
 0x1ea   : > { %v268_v49 = vpop.xlane.xlu0 %267 }
 0x1eb   : > { %v269_v50 = vrot.slane %v268_v49, 4 }
 0x1ed   : > { %v270_v51 = vadd.f32 %v269_v50, %v268_v49 }
 0x1ee   : > { %v284_v52 = vpop.xlane.xlu0 %283 }
 0x1ef   : > { %v271_v53 = vrot.slane %v270_v51, 2  ;;  %v285_v54 = vrot.slane %v284_v52, 4 }
 0x1f1   : > { %v286_v55 = vadd.f32 %v285_v54, %v284_v52  ;;  %v272_v56 = vadd.f32 %v271_v53, %v270_v51 }
 0x1f3   : > { %v287_v57 = vrot.slane %v286_v55, 2  ;;  %v273_v58 = vrot.slane %v272_v56, 1 }
 0x1f5   : > { %v288_v59 = vadd.f32 %v287_v57, %v286_v55  ;;  %v274_v60 = vadd.f32 %v273_v58, %v272_v56 }
 0x1f7   : > { %400 = vpush %v274_v60  ;;  %v289_v61 = vrot.slane %v288_v59, 1 }
 0x1f9   : > { %v290_v62 = vadd.f32 %v289_v61, %v288_v59 }
 0x1fb   : > { %402 = vpush %v290_v62 }
 0x228   : > { %s401_s5 = spop %400 }
 0x229   : > { %v296_v0 = vstv %s401_s5 }
 0x22c   : > { %s403_s8 = spop %402 }
 0x22d   : > { %v294_v63 = vstv %s403_s8 }
 0x22e   : > { %v295_v1 = vsel %vm293_vm9, %v294_v63, 0.0 }
 0x22f   : > { %v297_v2 = vsel %vm292_vm10, %v296_v0, %v295_v1 }
 0x230   : > { %298 = vst [vmem:[%s177_s6] sm:$0xff] %v297_v2 }
 0x231   : > { %468 = shalt.err (!%p465_p3)
}
 0x232   : > { %s469_s25 = scalar_lea.hbm %s624_s17, 128  ;;  %s473_s28 = scalar_lea.hbm %s668_s2, 256 }
 0x233   : > { %p470_p4 = scmp.ne.s32.totalorder %s624_s17, %s469_s25  ;;  %p474_p9 = scmp.lt.u32.totalorder %s624_s17, %s668_s2 }
 0x234   : > { %p475_p10 = scmp.lt.u32.totalorder %s473_s28, %s469_s25  ;;  %p477_p12 = scmp.lt.u32.totalorder %s469_s25, %s624_s17 }
 0x235   : > { %p471_p7 = pnand %p470_p4, %p575_p5 }
 0x236   : > { %p476_p11 = por %p475_p10, %p474_p9 }
 0x237   : > { %p472_p8 = pneg %p471_p7 }
 0x238   : > { %p478_p13 = por %p477_p12, %p476_p11 }
 0x23a   : > { %p479_p0 = pnand %p478_p13, %p472_p8 }
 0x23c   : > { %482 = shalt.err (!%p479_p0)
}
 0x23d   : > { %404 = dma.vmem_to_hbm [thread:$0]  (%p575_p5), %s626_s7, 128, %s624_s17, %s300_s13  }
 0x23e PF: > { %p410_p1 = scmp.ge.s32.totalorder %s517_s12, 2  ;;  %s325_s3 = sand.u32 1, %s505_s9  }
 0x23f   : > { %s326_s4 = scalar_lea.sflag [#allocation3], %s325_s3 }
 0x240   : > { %p407_p2 = pnand %p410_p1, %p579_p6 }
 0x242   : > { %500 = dma.done.wait (!%p407_p2), %s326_s4, 128  }
 0x243   : > { %502 = vsyncadd (!%p407_p2), %s326_s4, 4294967168  ;;  %p12_p3 = scmp.ge.s32.totalorder %s562_s15, 4   ;;  %s675_s9 = smov %s509_s10 }
 0x244   : > { %s676_s10 = smov %s513_s11  ;;  %s677_s11 = smov %s573_s18 }
 0x245   : > { %s678_s12 = smov %s562_s15  ;;  %14 = sbr.rel (!%p12_p3) target bundleno = 3 (0x3), region = 66 }
 0x24c   :  { %331 = vsyncpa [#allocation3], 1 }
 0x24d   :  { %333 = vsyncpa [#allocation3 + $0x1], 1 }

</bundles_post_ra>
